<compile_context>
chip_gen: v6e
topology: v6e:2x2x1
jax: 0.10.0
libtpu: 0.0.40
codegen_flags: <defaults>
</compile_context>

<pallas_src>
import math
import functools

import jax
import jax.numpy as jnp
from jax import lax
from jax.experimental import pallas as pl
from jax.experimental.pallas import tpu as pltpu

EPS = 1e-5                       # nn.LayerNorm default


def _default_vmem_limit():
    # Generation-aware scoped-VMEM budget: ~75% of physical VMEM (v7x ~48 MiB,
    # v5e/v6e ~96 MiB) so pipelining buffers always keep headroom.
    try:
        info_fn = getattr(pltpu, "get_tpu_info", None)
        if info_fn is not None:
            cap = getattr(info_fn(), "vmem_capacity_bytes", None)
            if cap:
                return int(cap) * 3 // 4
    except Exception:
        pass
    return 48 * 1024 * 1024


VMEM_LIMIT = _default_vmem_limit()


def _layernorm(x, g, b):
    # f32 statistics
    mu = jnp.mean(x, axis=-1, keepdims=True)
    var = jnp.mean((x - mu) ** 2, axis=-1, keepdims=True)
    return (x - mu) * lax.rsqrt(var + EPS) * g + b


# ------------------------------------------------------------------ kernels


def embed_pre_kernel(p_ref, w_ref, cls_ref, pos_ref, g_ref, b_ref, o_ref):
    # p_ref: (1, P, Kp) bf16 patches of one image; w_ref: (Kp, D) bf16 (Kp = K padded
    # to a multiple of 128); cls_ref: (1, D) f32; pos_ref: (L0, D) f32;
    # o_ref: (1, L0, D) bf16 residual stream.
    # LayerNorm is per-token, so cls row and patch rows are written separately
    # (no (L0, D) concat materialized).
    emb = jnp.dot(p_ref[0], w_ref[...], preferred_element_type=jnp.float32)    # (P, D)
    g = g_ref[...]
    b = b_ref[...]
    o_ref[0, 0:1, :] = _layernorm(cls_ref[...] + pos_ref[0:1, :], g, b).astype(o_ref.dtype)
    o_ref[0, 1:, :] = _layernorm(emb + pos_ref[1:, :], g, b).astype(o_ref.dtype)


def block_kernel(x_ref, ln1g, ln1b, wqkv, bqkv, wo, bo, ln2g, ln2b,
                 w1, b1, w2, b2, o_ref, attn_ref, qkv_sc, attn_sc, ctx_sc,
                 *, num_heads, head_dim, heads_per_group):
    # x_ref/o_ref: (1, L, D) bf16 residual stream.  wqkv: (D, 3D) bf16 (q-scale already
    # folded into the Q columns), wo: (D, D) bf16, w1: (D, 4D) bf16, w2: (4D, D) bf16.
    # Biases / LN params f32.  attn_ref: (1, L, lpad) f32 (lane-dense, padding columns
    # sliced off outside).  Scratch: qkv_sc (L, 3D) bf16, attn_sc (L, lpad) f32,
    # ctx_sc (L, D) f32.
    x = x_ref[0].astype(jnp.float32)                          # (L, D) f32
    L, D = x.shape
    h = _layernorm(x, ln1g[...], ln1b[...]).astype(jnp.bfloat16)

    # fused QKV projection: one full-width MXU matmul, staged once as bf16 in VMEM
    qkv_sc[...] = (jnp.dot(h, wqkv[...], preferred_element_type=jnp.float32)
                   + bqkv[...]).astype(jnp.bfloat16)

    attn_sc[...] = jnp.zeros_like(attn_sc)                    # lane-padded accumulator
    gw = heads_per_group * head_dim                           # lane-aligned group width
    n_groups = num_heads // heads_per_group

    def group_body(g_idx, carry):
        offq = pl.multiple_of(g_idx * gw, gw)
        offk = pl.multiple_of(D + g_idx * gw, gw)
        offv = pl.multiple_of(2 * D + g_idx * gw, gw)
        qg = qkv_sc[:, pl.ds(offq, gw)]                       # (L, gw) bf16
        kg = qkv_sc[:, pl.ds(offk, gw)]
        vg = qkv_sc[:, pl.ds(offv, gw)]
        ctx_parts = []
        for hh in range(heads_per_group):                     # tiny static inner loop
            lo = hh * head_dim
            qh = qg[:, lo:lo + head_dim]
            kh = kg[:, lo:lo + head_dim]
            vh = vg[:, lo:lo + head_dim]
            # contract over head_dim directly: no per-head XLU transpose of K
            s = lax.dot_general(qh, kh, (((1,), (1,)), ((), ())),
                                preferred_element_type=jnp.float32)      # (L, L) f32
            s = s - jnp.max(s, axis=-1, keepdims=True)
            p = jnp.exp(s)
            p = p * pl.reciprocal(jnp.sum(p, axis=-1, keepdims=True), approx=True)
            attn_sc[:, :L] += p
            ctx_parts.append(jnp.dot(p.astype(jnp.bfloat16), vh,
                                     preferred_element_type=jnp.float32))
        ctx = ctx_parts[0] if heads_per_group == 1 else jnp.concatenate(ctx_parts, -1)
        ctx_sc[:, pl.ds(offq, gw)] = ctx                      # one lane-dense group store
        return carry

    lax.fori_loop(0, n_groups, group_body, 0, unroll=True)

    # single full-width output projection + residual
    ao = jnp.dot(ctx_sc[...].astype(jnp.bfloat16), wo[...],
                 preferred_element_type=jnp.float32) + bo[...]
    x = x + ao

    # nn.MultiheadAttention default: attention weights averaged over heads.  The scratch
    # is already lane-padded, so this store is unmasked / lane-dense.
    attn_ref[0] = attn_sc[...] * (1.0 / num_heads)

    # MLP with QuickGELU
    h2 = _layernorm(x, ln2g[...], ln2b[...]).astype(jnp.bfloat16)
    m = jnp.dot(h2, w1[...], preferred_element_type=jnp.float32) + b1[...]
    m = m * jax.nn.sigmoid(1.702 * m)                         # CLIP QuickGELU
    m = jnp.dot(m.astype(jnp.bfloat16), w2[...],
                preferred_element_type=jnp.float32) + b2[...]
    o_ref[0] = (x + m).astype(o_ref.dtype)


def head_kernel(x_ref, g_ref, b_ref, proj_ref, o_ref):
    # ln_post on CLS tokens + visual projection.  x_ref: (B, D) bf16.
    h = _layernorm(x_ref[...].astype(jnp.float32), g_ref[...], b_ref[...])
    o_ref[...] = jnp.dot(h.astype(jnp.bfloat16), proj_ref[...],
                         preferred_element_type=jnp.float32)


# ------------------------------------------------------------------ wrappers


def _weight_spec(shape, single_buffer):
    # Grid-invariant parameter (constant index_map across the batch grid axis).
    # With single_buffer=True the block is single-buffered (pl.Buffered(1)):
    # double-buffering a grid-invariant weight slab is pure VMEM waste.
    nd = len(shape)
    idx = lambda i, _nd=nd: (0,) * _nd
    if single_buffer:
        try:
            return pl.BlockSpec(shape, idx, pipeline_mode=pl.Buffered(1))
        except Exception:
            pass
    return pl.BlockSpec(shape, idx)


def run_embed_pre(patches, wmat, cls_row, pos, g, b, single_buffer):
    B, P, Kp = patches.shape
    D = wmat.shape[1]
    L0 = P + 1
    return pl.pallas_call(
        embed_pre_kernel,
        grid=(B,),
        in_specs=[pl.BlockSpec((1, P, Kp), lambda i: (i, 0, 0)),
                  _weight_spec(wmat.shape, single_buffer),
                  _weight_spec(cls_row.shape, single_buffer),
                  _weight_spec(pos.shape, single_buffer),
                  _weight_spec(g.shape, single_buffer),
                  _weight_spec(b.shape, single_buffer)],
        out_specs=pl.BlockSpec((1, L0, D), lambda i: (i, 0, 0)),
        out_shape=jax.ShapeDtypeStruct((B, L0, D), jnp.bfloat16),
        compiler_params=pltpu.CompilerParams(
            dimension_semantics=("parallel",), vmem_limit_bytes=VMEM_LIMIT),
    )(patches, wmat, cls_row, pos, g, b)


def run_block(x, lp, num_heads, single_buffer):
    B, L, D = x.shape
    hd = D // num_heads
    # head group width = heads_per_group * head_dim, a multiple of 128 at real CLIP
    # head_dim (64) so qkv slices and ctx stores are lane-dense.
    hpg = max(1, min(num_heads, 128 // hd))
    while num_heads % hpg:
        hpg -= 1
    lpad = ((L + 127) // 128) * 128          # lane-dense attn-weights writeback
    plist = [lp["ln1_g"], lp["ln1_b"], lp["w_qkv"], lp["b_qkv"],
             lp["w_o"], lp["b_o"], lp["ln2_g"], lp["ln2_b"],
             lp["w1"], lp["b1"], lp["w2"], lp["b2"]]
    kernel = functools.partial(block_kernel, num_heads=num_heads, head_dim=hd,
                               heads_per_group=hpg)
    # TODO(synk): for v7x (2 TCs) with small B, add a second "parallel" grid axis
    # tiling the query rows so both TensorCores stay busy at B=1.
    # TODO(synk): at real CLIP widths, if a whole block exceeds the per-generation VMEM
    # budget, split attention / MLP into two pallas_calls or tile the 4D hidden dim.
    return pl.pallas_call(
        kernel,
        grid=(B,),
        in_specs=[pl.BlockSpec((1, L, D), lambda i: (i, 0, 0))]
                 + [_weight_spec(p.shape, single_buffer) for p in plist],
        out_specs=(pl.BlockSpec((1, L, D), lambda i: (i, 0, 0)),
                   pl.BlockSpec((1, L, lpad), lambda i: (i, 0, 0))),
        out_shape=(jax.ShapeDtypeStruct((B, L, D), jnp.bfloat16),
                   jax.ShapeDtypeStruct((B, L, lpad), jnp.float32)),
        scratch_shapes=[pltpu.VMEM((L, 3 * D), jnp.bfloat16),   # staged bf16 QKV
                        pltpu.VMEM((L, lpad), jnp.float32),     # lane-padded attn accum
                        pltpu.VMEM((L, D), jnp.float32)],       # per-group context slab
        compiler_params=pltpu.CompilerParams(
            dimension_semantics=("parallel",), vmem_limit_bytes=VMEM_LIMIT),
    )(x, *plist)


def run_head(x_cls, g, b, proj):
    B, D = x_cls.shape
    out_dim = proj.shape[1]
    return pl.pallas_call(
        head_kernel,
        out_shape=jax.ShapeDtypeStruct((B, out_dim), jnp.float32),
        compiler_params=pltpu.CompilerParams(vmem_limit_bytes=VMEM_LIMIT),
    )(x_cls, g, b, proj)


# ------------------------------------------------------------------ parameters


def init_params(key, *, depth=2, D=32, heads=4, patch=4, img=16, n_ctx=2,
                out_dim=16, cin=3):
    L0 = (img // patch) ** 2 + 1
    keys = iter(jax.random.split(key, 64))

    def nrm(shape, std=0.02):
        return std * jax.random.normal(next(keys), shape, jnp.float32)

    p = dict(
        conv_w=nrm((D, cin, patch, patch)),           # Conv2d(cin, D, patch, patch, bias=False)
        class_embedding=nrm((D,)),
        positional_embedding=nrm((L0, D)),
        ln_pre_g=jnp.ones((1, D), jnp.float32), ln_pre_b=jnp.zeros((1, D), jnp.float32),
        ln_post_g=jnp.ones((1, D), jnp.float32), ln_post_b=jnp.zeros((1, D), jnp.float32),
        proj=nrm((D, out_dim)).astype(jnp.bfloat16),
        ctx=nrm((depth, n_ctx, D)),                   # VPTDeepPromptLearner.ctx (std=0.02)
        heads=heads, n_ctx=n_ctx, depth=depth, patch=patch, cin=cin,
    )
    scale = 1.0 / math.sqrt(D // heads)
    layers = []
    for _ in range(depth):
        wq, wk, wv = nrm((D, D)), nrm((D, D)), nrm((D, D))
        layers.append(dict(
            ln1_g=jnp.ones((1, D), jnp.float32), ln1_b=jnp.zeros((1, D), jnp.float32),
            # fused in-projection with the 1/sqrt(head_dim) q-scale folded into the Q
            # columns at packing time (would also scale the Q third of a non-zero bias).
            w_qkv=jnp.concatenate([wq * scale, wk, wv], axis=1).astype(jnp.bfloat16),
            b_qkv=jnp.zeros((1, 3 * D), jnp.float32),
            w_o=nrm((D, D)).astype(jnp.bfloat16),
            b_o=jnp.zeros((1, D), jnp.float32),
            ln2_g=jnp.ones((1, D), jnp.float32), ln2_b=jnp.zeros((1, D), jnp.float32),
            w1=nrm((D, 4 * D)).astype(jnp.bfloat16),
            b1=jnp.zeros((1, 4 * D), jnp.float32),
            w2=nrm((4 * D, D)).astype(jnp.bfloat16),
            b2=jnp.zeros((1, D), jnp.float32),
        ))
    p["layers"] = layers
    return p


# ------------------------------------------------------------------ forward (glue + kernels)


def image_encoder_vptd(x, p, single_buffer_weights=True):
    """x: (B, Cin, H, W) f32 -> (features (B, out_dim), attn weights (layers, B, L, L))."""
    B, Cin, H, W = x.shape
    D = p["conv_w"].shape[0]
    ps = p["patch"]
    nh, nw = H // ps, W // ps
    P = nh * nw
    K = Cin * ps * ps
    Kp = ((K + 127) // 128) * 128                 # MXU-aligned contraction dim

    # conv1 expressed as a matmul over space-to-depth patches (glue reshape only)
    patches = x.reshape(B, Cin, nh, ps, nw, ps).transpose(0, 2, 4, 1, 3, 5)
    patches = patches.reshape(B, P, K).astype(jnp.bfloat16)
    wmat = p["conv_w"].reshape(D, K).T.astype(jnp.bfloat16)
    if Kp > K:
        patches = jnp.pad(patches, ((0, 0), (0, 0), (0, Kp - K)))
        wmat = jnp.pad(wmat, ((0, Kp - K), (0, 0)))

    # fused Pallas kernel: conv matmul + cls token + positional embedding + ln_pre
    cls_row = p["class_embedding"].reshape(1, D)
    tok = run_embed_pre(patches, wmat, cls_row, p["positional_embedding"],
                        p["ln_pre_g"], p["ln_pre_b"], single_buffer_weights)

    # Transformer_VPTD: deep visual prompts, each residual block as one Pallas kernel.
    # TODO(synk): pad L to a sublane multiple (with key-column masking) — token count
    # here is L0 + n_ctx, which may leave the last sublane group masked.
    n_ctx = p["n_ctx"]
    weights = []
    xt = tok
    for i in range(p["depth"]):
        if i != 0:
            xt = xt[:, :-n_ctx, :]
        ctx_i = jnp.broadcast_to(p["ctx"][i][None].astype(jnp.bfloat16), (B, n_ctx, D))
        xt = jnp.concatenate([xt, ctx_i], axis=1)
        L = xt.shape[1]
        xt, attn_pad = run_block(xt, p["layers"][i], p["heads"], single_buffer_weights)
        weights.append(attn_pad[:, :, :L])    # drop lane-padding columns
    weights = jnp.stack(weights)              # (layers, B, L, L) head-averaged attn weights

    # ln_post on CLS token + visual projection (Pallas)
    feats = run_head(xt[:, 0, :], p["ln_post_g"], p["ln_post_b"], p["proj"])
    return feats, weights


# ------------------------------------------------------------------ main


if __name__ == "__main__":
    key = jax.random.PRNGKey(0)
    k_params, k_x = jax.random.split(key)

    # small shapes: batch=2, 3x16x16 image, patch=4 -> 16 patches + cls = 17 tokens,
    # width=32, 4 heads, 2 layers, 2 deep-prompt tokens, output_dim=16
    # TODO(synk): toy width D=32 (< 128 lanes) under-fills vregs; real CLIP widths
    # (D multiple of 128, head_dim=64) use the same kernels at full lane utilization.
    params = init_params(k_params, depth=2, D=32, heads=4, patch=4, img=16,
                         n_ctx=2, out_dim=16, cin=3)
    x = jax.random.normal(k_x, (2, 3, 16, 16), jnp.float32)

    def _forward(single_buffer):
        out = image_encoder_vptd(x, params, single_buffer_weights=single_buffer)
        jax.block_until_ready(out)
        return out

    try:
        feats, attn_weights = _forward(True)
    except Exception:
        # Fallback for JAX builds where pl.Buffered(1) single-buffering of the
        # grid-invariant weight specs is not accepted by the Mosaic lowering.
        feats, attn_weights = _forward(False)

    assert feats.shape == (2, 16)
    assert attn_weights.shape == (2, 2, 19, 19)   # (layers, B, L, L), L = 17 + n_ctx
    print("KERNEL_OK")
</pallas_src>

<mosaic_0001>
module attributes {stable_mosaic.version = 11 : i64} {
  func.func @embed_pre_kernel(%arg0: i32, %arg1: memref<1x16x128xbf16, #tpu.memory_space<vmem>>, %arg2: memref<128x32xbf16, #tpu.memory_space<vmem>>, %arg3: memref<1x32xf32, #tpu.memory_space<vmem>>, %arg4: memref<17x32xf32, #tpu.memory_space<vmem>>, %arg5: memref<1x32xf32, #tpu.memory_space<vmem>>, %arg6: memref<1x32xf32, #tpu.memory_space<vmem>>, %arg7: memref<1x17x32xbf16, #tpu.memory_space<vmem>>) attributes {dimension_semantics = [#tpu.dimension_semantics<parallel>], iteration_bounds = array<i64: 2>, scalar_prefetch = 0 : i64, scratch_operands = 0 : i64, tpu.core_type = #tpu.core_type<tc>, window_params = [{transform_indices = @transform_0, window_bounds = array<i64: 1, 16, 128>}, {pipeline_mode = #tpu.pipeline_mode<synchronous>, transform_indices = @transform_1, window_bounds = array<i64: 128, 32>}, {pipeline_mode = #tpu.pipeline_mode<synchronous>, transform_indices = @transform_2, window_bounds = array<i64: 1, 32>}, {pipeline_mode = #tpu.pipeline_mode<synchronous>, transform_indices = @transform_3, window_bounds = array<i64: 17, 32>}, {pipeline_mode = #tpu.pipeline_mode<synchronous>, transform_indices = @transform_4, window_bounds = array<i64: 1, 32>}, {pipeline_mode = #tpu.pipeline_mode<synchronous>, transform_indices = @transform_5, window_bounds = array<i64: 1, 32>}, {transform_indices = @transform_6, window_bounds = array<i64: 1, 17, 32>}]} {
    %c0 = arith.constant 0 : index
    %c0_0 = arith.constant 0 : index
    %c0_1 = arith.constant 0 : index
    %0 = vector.load %arg1[%c0, %c0_0, %c0_1] : memref<1x16x128xbf16, #tpu.memory_space<vmem>>, vector<1x16x128xbf16>
    %1 = vector.shape_cast %0 : vector<1x16x128xbf16> to vector<16x128xbf16>
    %c0_2 = arith.constant 0 : index
    %c0_3 = arith.constant 0 : index
    %2 = vector.load %arg2[%c0_2, %c0_3] : memref<128x32xbf16, #tpu.memory_space<vmem>>, vector<128x32xbf16>
    %cst = arith.constant dense<0.000000e+00> : vector<16x32xf32>
    %3 = tpu.matmul %1, %2, %cst {dimension_numbers = #tpu.dot_dimension_numbers<[1], [0], [0], [1], [0, 0, 1, 1], [], []>} : vector<16x128xbf16>, vector<128x32xbf16>, vector<16x32xf32> -> vector<16x32xf32>
    %c0_4 = arith.constant 0 : index
    %c0_5 = arith.constant 0 : index
    %4 = vector.load %arg5[%c0_4, %c0_5] : memref<1x32xf32, #tpu.memory_space<vmem>>, vector<1x32xf32>
    %c0_6 = arith.constant 0 : index
    %c0_7 = arith.constant 0 : index
    %5 = vector.load %arg6[%c0_6, %c0_7] : memref<1x32xf32, #tpu.memory_space<vmem>>, vector<1x32xf32>
    %c0_8 = arith.constant 0 : index
    %c0_9 = arith.constant 0 : index
    %6 = vector.load %arg3[%c0_8, %c0_9] : memref<1x32xf32, #tpu.memory_space<vmem>>, vector<1x32xf32>
    %c0_10 = arith.constant 0 : index
    %c0_11 = arith.constant 0 : index
    %7 = vector.load %arg4[%c0_10, %c0_11] : memref<17x32xf32, #tpu.memory_space<vmem>>, vector<1x32xf32>
    %8 = arith.addf %6, %7 : vector<1x32xf32>
    %cst_12 = arith.constant dense<0.000000e+00> : vector<1xf32>
    %9 = vector.multi_reduction <add>, %8, %cst_12 [1] : vector<1x32xf32> to vector<1xf32>
    %10 = vector.shape_cast %9 : vector<1xf32> to vector<1x1xf32>
    %cst_13 = arith.constant 3.200000e+01 : f32
    %11 = vector.broadcast %cst_13 : f32 to vector<1x1xf32>
    %12 = arith.divf %10, %11 : vector<1x1xf32>
    %13 = vector.broadcast %12 : vector<1x1xf32> to vector<1x32xf32>
    %14 = arith.subf %8, %13 : vector<1x32xf32>
    %15 = arith.mulf %14, %14 : vector<1x32xf32>
    %cst_14 = arith.constant dense<0.000000e+00> : vector<1xf32>
    %16 = vector.multi_reduction <add>, %15, %cst_14 [1] : vector<1x32xf32> to vector<1xf32>
    %17 = vector.shape_cast %16 : vector<1xf32> to vector<1x1xf32>
    %cst_15 = arith.constant 3.200000e+01 : f32
    %18 = vector.broadcast %cst_15 : f32 to vector<1x1xf32>
    %19 = arith.divf %17, %18 : vector<1x1xf32>
    %20 = vector.broadcast %12 : vector<1x1xf32> to vector<1x32xf32>
    %21 = arith.subf %8, %20 : vector<1x32xf32>
    %cst_16 = arith.constant 9.99999974E-6 : f32
    %22 = vector.broadcast %cst_16 : f32 to vector<1x1xf32>
    %23 = arith.addf %19, %22 : vector<1x1xf32>
    %24 = math.rsqrt %23 : vector<1x1xf32>
    %25 = vector.broadcast %24 : vector<1x1xf32> to vector<1x32xf32>
    %26 = arith.mulf %21, %25 : vector<1x32xf32>
    %27 = arith.mulf %26, %4 : vector<1x32xf32>
    %28 = arith.addf %27, %5 : vector<1x32xf32>
    %29 = arith.truncf %28 : vector<1x32xf32> to vector<1x32xbf16>
    %c0_17 = arith.constant 0 : index
    %c0_18 = arith.constant 0 : index
    %c0_19 = arith.constant 0 : index
    %30 = vector.load %arg7[%c0_17, %c0_18, %c0_19] : memref<1x17x32xbf16, #tpu.memory_space<vmem>>, vector<1x1x32xbf16>
    %31 = vector.shape_cast %30 : vector<1x1x32xbf16> to vector<1x32xbf16>
    %32 = vector.shape_cast %29 : vector<1x32xbf16> to vector<1x1x32xbf16>
    tpu.vector_store %arg7[%c0_17, %c0_18, %c0_19], %32 {strides = array<i32>} : memref<1x17x32xbf16, #tpu.memory_space<vmem>>, vector<1x1x32xbf16>,
    %c1 = arith.constant 1 : index
    %c0_20 = arith.constant 0 : index
    %33 = vector.load %arg4[%c1, %c0_20] : memref<17x32xf32, #tpu.memory_space<vmem>>, vector<16x32xf32>
    %34 = arith.addf %3, %33 : vector<16x32xf32>
    %cst_21 = arith.constant dense<0.000000e+00> : vector<16xf32>
    %35 = vector.multi_reduction <add>, %34, %cst_21 [1] : vector<16x32xf32> to vector<16xf32>
    %36 = vector.shape_cast %35 : vector<16xf32> to vector<16x1xf32>
    %cst_22 = arith.constant 3.200000e+01 : f32
    %37 = vector.broadcast %cst_22 : f32 to vector<16x1xf32>
    %38 = arith.divf %36, %37 : vector<16x1xf32>
    %39 = vector.broadcast %38 : vector<16x1xf32> to vector<16x32xf32>
    %40 = arith.subf %34, %39 : vector<16x32xf32>
    %41 = arith.mulf %40, %40 : vector<16x32xf32>
    %cst_23 = arith.constant dense<0.000000e+00> : vector<16xf32>
    %42 = vector.multi_reduction <add>, %41, %cst_23 [1] : vector<16x32xf32> to vector<16xf32>
    %43 = vector.shape_cast %42 : vector<16xf32> to vector<16x1xf32>
    %cst_24 = arith.constant 3.200000e+01 : f32
    %44 = vector.broadcast %cst_24 : f32 to vector<16x1xf32>
    %45 = arith.divf %43, %44 : vector<16x1xf32>
    %46 = vector.broadcast %38 : vector<16x1xf32> to vector<16x32xf32>
    %47 = arith.subf %34, %46 : vector<16x32xf32>
    %cst_25 = arith.constant 9.99999974E-6 : f32
    %48 = vector.broadcast %cst_25 : f32 to vector<16x1xf32>
    %49 = arith.addf %45, %48 : vector<16x1xf32>
    %50 = math.rsqrt %49 : vector<16x1xf32>
    %51 = vector.broadcast %50 : vector<16x1xf32> to vector<16x32xf32>
    %52 = arith.mulf %47, %51 : vector<16x32xf32>
    %53 = vector.broadcast %4 : vector<1x32xf32> to vector<16x32xf32>
    %54 = arith.mulf %52, %53 : vector<16x32xf32>
    %55 = vector.broadcast %5 : vector<1x32xf32> to vector<16x32xf32>
    %56 = arith.addf %54, %55 : vector<16x32xf32>
    %57 = arith.truncf %56 : vector<16x32xf32> to vector<16x32xbf16>
    %c0_26 = arith.constant 0 : index
    %c1_27 = arith.constant 1 : index
    %c0_28 = arith.constant 0 : index
    %58 = vector.load %arg7[%c0_26, %c1_27, %c0_28] : memref<1x17x32xbf16, #tpu.memory_space<vmem>>, vector<1x16x32xbf16>
    %59 = vector.shape_cast %58 : vector<1x16x32xbf16> to vector<16x32xbf16>
    %60 = vector.shape_cast %57 : vector<16x32xbf16> to vector<1x16x32xbf16>
    tpu.vector_store %arg7[%c0_26, %c1_27, %c0_28], %60 {strides = array<i32>} : memref<1x17x32xbf16, #tpu.memory_space<vmem>>, vector<1x16x32xbf16>,
    return
  }
  func.func @transform_0(%arg0: i32) -> (i32, i32, i32) {
    %c0_i32 = arith.constant 0 : i32
    %c0_i32_0 = arith.constant 0 : i32
    %c0_i32_1 = arith.constant 0 : i32
    return %arg0, %c0_i32, %c0_i32_0 : i32, i32, i32
  }
  func.func @transform_1(%arg0: i32) -> (i32, i32) {
    %c0_i32 = arith.constant 0 : i32
    %c0_i32_0 = arith.constant 0 : i32
    %c0_i32_1 = arith.constant 0 : i32
    return %c0_i32, %c0_i32_0 : i32, i32
  }
  func.func @transform_2(%arg0: i32) -> (i32, i32) {
    %c0_i32 = arith.constant 0 : i32
    %c0_i32_0 = arith.constant 0 : i32
    %c0_i32_1 = arith.constant 0 : i32
    return %c0_i32, %c0_i32_0 : i32, i32
  }
  func.func @transform_3(%arg0: i32) -> (i32, i32) {
    %c0_i32 = arith.constant 0 : i32
    %c0_i32_0 = arith.constant 0 : i32
    %c0_i32_1 = arith.constant 0 : i32
    return %c0_i32, %c0_i32_0 : i32, i32
  }
  func.func @transform_4(%arg0: i32) -> (i32, i32) {
    %c0_i32 = arith.constant 0 : i32
    %c0_i32_0 = arith.constant 0 : i32
    %c0_i32_1 = arith.constant 0 : i32
    return %c0_i32, %c0_i32_0 : i32, i32
  }
  func.func @transform_5(%arg0: i32) -> (i32, i32) {
    %c0_i32 = arith.constant 0 : i32
    %c0_i32_0 = arith.constant 0 : i32
    %c0_i32_1 = arith.constant 0 : i32
    return %c0_i32, %c0_i32_0 : i32, i32
  }
  func.func @transform_6(%arg0: i32) -> (i32, i32, i32) {
    %c0_i32 = arith.constant 0 : i32
    %c0_i32_0 = arith.constant 0 : i32
    %c0_i32_1 = arith.constant 0 : i32
    return %arg0, %c0_i32, %c0_i32_0 : i32, i32, i32
  }
}

module attributes {stable_mosaic.version = 11 : i64} {
  func.func @embed_pre_kernel(%arg0: i32, %arg1: memref<1x16x128xbf16, #tpu.memory_space<vmem>>, %arg2: memref<128x32xbf16, #tpu.memory_space<vmem>>, %arg3: memref<1x32xf32, #tpu.memory_space<vmem>>, %arg4: memref<17x32xf32, #tpu.memory_space<vmem>>, %arg5: memref<1x32xf32, #tpu.memory_space<vmem>>, %arg6: memref<1x32xf32, #tpu.memory_space<vmem>>, %arg7: memref<1x17x32xbf16, #tpu.memory_space<vmem>>) attributes {dimension_semantics = [#tpu.dimension_semantics<parallel>], iteration_bounds = array<i64: 2>, scalar_prefetch = 0 : i64, scratch_operands = 0 : i64, tpu.core_type = #tpu.core_type<tc>, window_params = [{transform_indices = @transform_0, window_bounds = array<i64: 1, 16, 128>}, {pipeline_mode = #tpu.pipeline_mode<synchronous>, transform_indices = @transform_1, window_bounds = array<i64: 128, 32>}, {pipeline_mode = #tpu.pipeline_mode<synchronous>, transform_indices = @transform_2, window_bounds = array<i64: 1, 32>}, {pipeline_mode = #tpu.pipeline_mode<synchronous>, transform_indices = @transform_3, window_bounds = array<i64: 17, 32>}, {pipeline_mode = #tpu.pipeline_mode<synchronous>, transform_indices = @transform_4, window_bounds = array<i64: 1, 32>}, {pipeline_mode = #tpu.pipeline_mode<synchronous>, transform_indices = @transform_5, window_bounds = array<i64: 1, 32>}, {transform_indices = @transform_6, window_bounds = array<i64: 1, 17, 32>}]} {
    %c0 = arith.constant 0 : index
    %c0_0 = arith.constant 0 : index
    %c0_1 = arith.constant 0 : index
    %0 = vector.load %arg1[%c0, %c0_0, %c0_1] : memref<1x16x128xbf16, #tpu.memory_space<vmem>>, vector<1x16x128xbf16>
    %1 = vector.shape_cast %0 : vector<1x16x128xbf16> to vector<16x128xbf16>
    %c0_2 = arith.constant 0 : index
    %c0_3 = arith.constant 0 : index
    %2 = vector.load %arg2[%c0_2, %c0_3] : memref<128x32xbf16, #tpu.memory_space<vmem>>, vector<128x32xbf16>
    %cst = arith.constant dense<0.000000e+00> : vector<16x32xf32>
    %3 = tpu.matmul %1, %2, %cst {dimension_numbers = #tpu.dot_dimension_numbers<[1], [0], [0], [1], [0, 0, 1, 1], [], []>} : vector<16x128xbf16>, vector<128x32xbf16>, vector<16x32xf32> -> vector<16x32xf32>
    %c0_4 = arith.constant 0 : index
    %c0_5 = arith.constant 0 : index
    %4 = vector.load %arg5[%c0_4, %c0_5] : memref<1x32xf32, #tpu.memory_space<vmem>>, vector<1x32xf32>
    %c0_6 = arith.constant 0 : index
    %c0_7 = arith.constant 0 : index
    %5 = vector.load %arg6[%c0_6, %c0_7] : memref<1x32xf32, #tpu.memory_space<vmem>>, vector<1x32xf32>
    %c0_8 = arith.constant 0 : index
    %c0_9 = arith.constant 0 : index
    %6 = vector.load %arg3[%c0_8, %c0_9] : memref<1x32xf32, #tpu.memory_space<vmem>>, vector<1x32xf32>
    %c0_10 = arith.constant 0 : index
    %c0_11 = arith.constant 0 : index
    %7 = vector.load %arg4[%c0_10, %c0_11] : memref<17x32xf32, #tpu.memory_space<vmem>>, vector<1x32xf32>
    %8 = arith.addf %6, %7 : vector<1x32xf32>
    %cst_12 = arith.constant dense<0.000000e+00> : vector<1xf32>
    %9 = vector.multi_reduction <add>, %8, %cst_12 [1] : vector<1x32xf32> to vector<1xf32>
    %10 = vector.shape_cast %9 : vector<1xf32> to vector<1x1xf32>
    %cst_13 = arith.constant 3.200000e+01 : f32
    %11 = vector.broadcast %cst_13 : f32 to vector<1x1xf32>
    %12 = arith.divf %10, %11 : vector<1x1xf32>
    %13 = vector.broadcast %12 : vector<1x1xf32> to vector<1x32xf32>
    %14 = arith.subf %8, %13 : vector<1x32xf32>
    %15 = arith.mulf %14, %14 : vector<1x32xf32>
    %cst_14 = arith.constant dense<0.000000e+00> : vector<1xf32>
    %16 = vector.multi_reduction <add>, %15, %cst_14 [1] : vector<1x32xf32> to vector<1xf32>
    %17 = vector.shape_cast %16 : vector<1xf32> to vector<1x1xf32>
    %cst_15 = arith.constant 3.200000e+01 : f32
    %18 = vector.broadcast %cst_15 : f32 to vector<1x1xf32>
    %19 = arith.divf %17, %18 : vector<1x1xf32>
    %20 = vector.broadcast %12 : vector<1x1xf32> to vector<1x32xf32>
    %21 = arith.subf %8, %20 : vector<1x32xf32>
    %cst_16 = arith.constant 9.99999974E-6 : f32
    %22 = vector.broadcast %cst_16 : f32 to vector<1x1xf32>
    %23 = arith.addf %19, %22 : vector<1x1xf32>
    %24 = math.rsqrt %23 : vector<1x1xf32>
    %25 = vector.broadcast %24 : vector<1x1xf32> to vector<1x32xf32>
    %26 = arith.mulf %21, %25 : vector<1x32xf32>
    %27 = arith.mulf %26, %4 : vector<1x32xf32>
    %28 = arith.addf %27, %5 : vector<1x32xf32>
    %29 = arith.truncf %28 : vector<1x32xf32> to vector<1x32xbf16>
    %c0_17 = arith.constant 0 : index
    %c0_18 = arith.constant 0 : index
    %c0_19 = arith.constant 0 : index
    %30 = vector.load %arg7[%c0_17, %c0_18, %c0_19] : memref<1x17x32xbf16, #tpu.memory_space<vmem>>, vector<1x1x32xbf16>
    %31 = vector.shape_cast %30 : vector<1x1x32xbf16> to vector<1x32xbf16>
    %32 = vector.shape_cast %29 : vector<1x32xbf16> to vector<1x1x32xbf16>
    tpu.vector_store %arg7[%c0_17, %c0_18, %c0_19], %32 {strides = array<i32>} : memref<1x17x32xbf16, #tpu.memory_space<vmem>>, vector<1x1x32xbf16>,
    %c1 = arith.constant 1 : index
    %c0_20 = arith.constant 0 : index
    %33 = vector.load %arg4[%c1, %c0_20] : memref<17x32xf32, #tpu.memory_space<vmem>>, vector<16x32xf32>
    %34 = arith.addf %3, %33 : vector<16x32xf32>
    %cst_21 = arith.constant dense<0.000000e+00> : vector<16xf32>
    %35 = vector.multi_reduction <add>, %34, %cst_21 [1] : vector<16x32xf32> to vector<16xf32>
    %36 = vector.shape_cast %35 : vector<16xf32> to vector<16x1xf32>
    %cst_22 = arith.constant 3.200000e+01 : f32
    %37 = vector.broadcast %cst_22 : f32 to vector<16x1xf32>
    %38 = arith.divf %36, %37 : vector<16x1xf32>
    %39 = vector.broadcast %38 : vector<16x1xf32> to vector<16x32xf32>
    %40 = arith.subf %34, %39 : vector<16x32xf32>
    %41 = arith.mulf %40, %40 : vector<16x32xf32>
    %cst_23 = arith.constant dense<0.000000e+00> : vector<16xf32>
    %42 = vector.multi_reduction <add>, %41, %cst_23 [1] : vector<16x32xf32> to vector<16xf32>
    %43 = vector.shape_cast %42 : vector<16xf32> to vector<16x1xf32>
    %cst_24 = arith.constant 3.200000e+01 : f32
    %44 = vector.broadcast %cst_24 : f32 to vector<16x1xf32>
    %45 = arith.divf %43, %44 : vector<16x1xf32>
    %46 = vector.broadcast %38 : vector<16x1xf32> to vector<16x32xf32>
    %47 = arith.subf %34, %46 : vector<16x32xf32>
    %cst_25 = arith.constant 9.99999974E-6 : f32
    %48 = vector.broadcast %cst_25 : f32 to vector<16x1xf32>
    %49 = arith.addf %45, %48 : vector<16x1xf32>
    %50 = math.rsqrt %49 : vector<16x1xf32>
    %51 = vector.broadcast %50 : vector<16x1xf32> to vector<16x32xf32>
    %52 = arith.mulf %47, %51 : vector<16x32xf32>
    %53 = vector.broadcast %4 : vector<1x32xf32> to vector<16x32xf32>
    %54 = arith.mulf %52, %53 : vector<16x32xf32>
    %55 = vector.broadcast %5 : vector<1x32xf32> to vector<16x32xf32>
    %56 = arith.addf %54, %55 : vector<16x32xf32>
    %57 = arith.truncf %56 : vector<16x32xf32> to vector<16x32xbf16>
    %c0_26 = arith.constant 0 : index
    %c1_27 = arith.constant 1 : index
    %c0_28 = arith.constant 0 : index
    %58 = vector.load %arg7[%c0_26, %c1_27, %c0_28] : memref<1x17x32xbf16, #tpu.memory_space<vmem>>, vector<1x16x32xbf16>
    %59 = vector.shape_cast %58 : vector<1x16x32xbf16> to vector<16x32xbf16>
    %60 = vector.shape_cast %57 : vector<16x32xbf16> to vector<1x16x32xbf16>
    tpu.vector_store %arg7[%c0_26, %c1_27, %c0_28], %60 {strides = array<i32>} : memref<1x17x32xbf16, #tpu.memory_space<vmem>>, vector<1x16x32xbf16>,
    return
  }
  func.func @transform_0(%arg0: i32) -> (i32, i32, i32) {
    %c0_i32 = arith.constant 0 : i32
    %c0_i32_0 = arith.constant 0 : i32
    %c0_i32_1 = arith.constant 0 : i32
    return %arg0, %c0_i32, %c0_i32_0 : i32, i32, i32
  }
  func.func @transform_1(%arg0: i32) -> (i32, i32) {
    %c0_i32 = arith.constant 0 : i32
    %c0_i32_0 = arith.constant 0 : i32
    %c0_i32_1 = arith.constant 0 : i32
    return %c0_i32, %c0_i32_0 : i32, i32
  }
  func.func @transform_2(%arg0: i32) -> (i32, i32) {
    %c0_i32 = arith.constant 0 : i32
    %c0_i32_0 = arith.constant 0 : i32
    %c0_i32_1 = arith.constant 0 : i32
    return %c0_i32, %c0_i32_0 : i32, i32
  }
  func.func @transform_3(%arg0: i32) -> (i32, i32) {
    %c0_i32 = arith.constant 0 : i32
    %c0_i32_0 = arith.constant 0 : i32
    %c0_i32_1 = arith.constant 0 : i32
    return %c0_i32, %c0_i32_0 : i32, i32
  }
  func.func @transform_4(%arg0: i32) -> (i32, i32) {
    %c0_i32 = arith.constant 0 : i32
    %c0_i32_0 = arith.constant 0 : i32
    %c0_i32_1 = arith.constant 0 : i32
    return %c0_i32, %c0_i32_0 : i32, i32
  }
  func.func @transform_5(%arg0: i32) -> (i32, i32) {
    %c0_i32 = arith.constant 0 : i32
    %c0_i32_0 = arith.constant 0 : i32
    %c0_i32_1 = arith.constant 0 : i32
    return %c0_i32, %c0_i32_0 : i32, i32
  }
  func.func @transform_6(%arg0: i32) -> (i32, i32, i32) {
    %c0_i32 = arith.constant 0 : i32
    %c0_i32_0 = arith.constant 0 : i32
    %c0_i32_1 = arith.constant 0 : i32
    return %arg0, %c0_i32, %c0_i32_0 : i32, i32, i32
  }
}

</mosaic_0001>

<bundles_post_ra>
// kernel: tpu_custom_call.1
= control target key start
LH: loop header
LB: loop body
LE: loop exit
PB: predicated region body
PF: predicated region fallthrough
CT: control target
= control target key end

     0   :  { %s658_s21 = smov 0   ;;  %s749_s0 = inlined_call_operand.vmem [shape: bf16[2,16,128], index: 0, kind: input, shape index: {}]   ;;  %s750_s1 = inlined_call_operand.vmem [shape: bf16[128,32], index: 1, kind: input, shape index: {}]   ;;  %s751_s2 = inlined_call_operand.vmem [shape: f32[1,32], index: 2, kind: input, shape index: {}]   ;;  %s752_s3 = inlined_call_operand.vmem [shape: f32[17,32], index: 3, kind: input, shape index: {}]   ;;  %s753_s4 = inlined_call_operand.vmem [shape: f32[1,32], index: 4, kind: input, shape index: {}]   ;;  %s754_s5 = inlined_call_operand.vmem [shape: f32[1,32], index: 5, kind: input, shape index: {}]   ;;  %s755_s6 = inlined_call_operand.vmem [shape: bf16[2,17,32], index: 6, kind: output, shape index: {}]  }
   0x1 LB: > { %s534_s22 = sadd.s32 4294967295, %s619_s21   ;;  %p538_p0 = scmp.ge.s32.totalorder %s619_s21, 1  ;;  %s619_s21 = sphi %s658_s21, %s16_s21  }
   0x2   : > { %p212_p1 = scmp.lt.s32.totalorder %s619_s21, 3 }
   0x4   : > { %p213_p2 = pnand %p538_p0, %p212_p1 }
   0x5   : > { %p242_p3 = scmp.lt.s32.totalorder (!%p213_p2), %s534_s22, 1 }
   0x6   : > { %216 = sbr.rel (%p213_p2) target bundleno = 561 (0x231), region = 44 }
   0xb   : > { %v598_v0 = vld [vmem:[%s750_s1 + $0x38] sm:$0xff]   ;;  %v621_v1 = vmov 0.0   ;;  %v599_v2 = vld [vmem:[%s750_s1 + $0x30] sm:$0xff]   ;;  %vm622_vm0 = vmmov 0   ;;  %s759_s22 = smov (!%p242_p3, %s534_s22), 1  ;;  %v600_v3 = vld [vmem:[%s750_s1 + $0x28] sm:$0xff]   ;;  %v425_v56 = vlaneseq }
   0xc   : > { %567 = vmatprep.subr.bf16.mxu0 %v621_v1  ;;  %583 = vmatprep.mubr.msk.bf16.mxu0 %vm622_vm0, %v621_v1  ;;  %s555_s29 = sshll.u32 %s759_s22, 3  ;;  %v273_v4 = vld [vmem:[%s751_s2] sm:$0x1]  ;;  %vm276_vm1 = vcmask 253952   ;;  %v602_v9 = vld [vmem:[%s750_s1 + $0x18] sm:$0xff]   ;;  %v603_v10 = vld [vmem:[%s750_s1 + $0x10] sm:$0xff]  }
   0xd   : > { %568 = vmatpush3.bf16.msra.mxu0 %v598_v0  ;;  %s246_s8 = scalar_lea.vmem %s749_s0, %s555_s29  ;;  %v274_v5 = vld [vmem:[%s752_s3] sm:$0x1]  ;;  %v604_v11 = vld [vmem:[%s750_s1 + $0x8] sm:$0xff]   ;;  %vm397_vm2 = vcmask 261120   ;;  %s587_s29 = smul.u32 12, %s759_s22  ;;  %v426_v59 = vshrl.u32 %v425_v56, 7 }
   0xe   : > { %569 = vmatprep.subr.bf16.mxu0 %v621_v1  ;;  %v601_v6 = vld [vmem:[%s750_s1 + $0x20] sm:$0xff]   ;;  %v275_v7 = vadd.f32 %v274_v5, %v273_v4  ;;  %v301_v21 = vld [vmem:[%s752_s3 + $0x9] sm:$0xff]  ;;  %vm295_vm3 = vsmask.f32 256  ;;  %vm468_vm5 = vcmask 257024  }
   0xf   : > { %v605_v12 = vld [vmem:[%s750_s1] sm:$0xff]   ;;  %s724_s12 = scalar_lea.vmem %s755_s6, %s587_s29  ;;  %vm729_vm4 = vmand %vm276_vm1, %vm295_vm3  ;;  %v427_v60 = vsub.s32 0, %v426_v59  ;;  %vm469_vm6 = vsmask.f32 7938  ;;  %vm446_vm8 = vsmask.f32 4368 }
  0x10   : > { %v277_v8 = vsel %vm276_vm1, %v275_v7, 0.0  ;;  %v606_v13 = vld [vmem:[%s246_s8] sm:$0xff]   ;;  %vm470_vm7 = vmand %vm468_vm5, %vm469_vm6 }
  0x11   : > { %570 = vmatpush3.bf16.msra.mxu0 %v599_v2  ;;  %278 = vadd.xlane.f32.xlu0 %v277_v8  ;;  %v300_v16 = vld [vmem:[%s752_s3 + $0x1] sm:$0xff]  ;;  %v271_v43 = vld [vmem:[%s753_s4] sm:$0x1]  ;;  %vm447_vm9 = vmor %vm295_vm3, %vm446_vm8 }
  0x12   : > { %571 = vmatprep.subr.bf16.mxu0 %v621_v1  ;;  %v272_v45 = vld [vmem:[%s754_s5] sm:$0x1]  ;;  %v428_v61 = vrot.slane %v271_v43, %v427_v60 }
  0x13   : > { %v297_v48 = vld [vmem:[%s724_s12] sm:$0x1]  ;;  %v436_v63 = vrot.slane %v272_v45, %v427_v60 }
  0x15   : > { %572 = vmatpush3.bf16.msra.mxu0 %v600_v3 }
  0x16   : > { %573 = vmatprep.subr.bf16.mxu0 %v621_v1 }
  0x19   : > { %574 = vmatpush3.bf16.msra.mxu0 %v601_v6 }
  0x1a   : > { %575 = vmatprep.subr.bf16.mxu0 %v621_v1 }
  0x1d   : > { %576 = vmatpush3.bf16.msra.mxu0 %v602_v9 }
  0x1e   : > { %577 = vmatprep.subr.bf16.mxu0 %v621_v1 }
  0x21   : > { %578 = vmatpush3.bf16.msra.mxu0 %v603_v10 }
  0x22   : > { %579 = vmatprep.subr.bf16.mxu0 %v621_v1 }
  0x25   : > { %580 = vmatpush3.bf16.msra.mxu0 %v604_v11 }
  0x26   : > { %581 = vmatprep.subr.bf16.mxu0 %v621_v1 }
  0x29   : > { %582 = vmatpush3.bf16.msra.mxu0 %v605_v12 }
  0x2c   : > { %584 = vmatmul.mubr.bf16.vlgmr.msra.gmra.mxu0 %v606_v13 }
  0x9a   : > { %v279_v14 = vpop.xlane.xlu0 %278 }
  0x9b   : > { %v281_v15 = vmul.f32 0.03125, %v279_v14 }
  0x9d   : > { %v282_v19 = vsub.f32 %v275_v7, %v281_v15 }
  0x9f   : > { %v283_v25 = vmul.f32 %v282_v19, %v282_v19 }
  0xa1   : > { %v284_v28 = vsel %vm276_vm1, %v283_v25, 0.0 }
  0xec   : > { %v390_v17 = vpop.f32.mrf.mxu0 }
  0xed   : > { %v391_v18 = vadd.f32 %v390_v17, %v300_v16 }
  0xee   : > { %v585_v20 = vpop.f32.mrf.mxu0 }
  0xef   : > { %v398_v22 = vsel %vm397_vm2, %v391_v18, 0.0 }
  0xf0   : > { %399 = vadd.xlane.f32.xlu0 %v398_v22  ;;  %v393_v23 = vpop.f32.mrf.mxu0 }
  0xf1   : > { %v394_v24 = vadd.f32 %v393_v23, %v301_v21 }
  0xf2   : > { %v586_v26 = vpop.f32.mrf.mxu0 }
  0xf3   : > { %v401_v27 = vsel %vm397_vm2, %v394_v24, 0.0 }
  0xf4   : > { %402 = vadd.xlane.f32.xlu1 %v401_v27 }
  0xf8   : > { %285 = vadd.xlane.f32.xlu1 %v284_v28 }
 0x179   : > { %v400_v29 = vpop.xlane.xlu0 %399 }
 0x17a   : > { %v404_v30 = vmul.f32 0.03125, %v400_v29 }
 0x17c   : > { %v406_v31 = vsub.f32 %v391_v18, %v404_v30  ;;  %v476_v18 = vld [vmem:[%s724_s12 + $0x8] sm:$0x1] }
 0x17d   : > { %v403_v32 = vpop.xlane.xlu1 %402 }
 0x17e   : > { %v405_v33 = vmul.f32 0.03125, %v403_v32  ;;  %v408_v34 = vmul.f32 %v406_v31, %v406_v31 }
 0x180   : > { %v407_v35 = vsub.f32 %v394_v24, %v405_v33  ;;  %v410_v36 = vsel %vm397_vm2, %v408_v34, 0.0 }
 0x181   : > { %411 = vadd.xlane.f32.xlu0 %v410_v36  ;;  %v286_v37 = vpop.xlane.xlu1 %285 }
 0x182   : > { %v287_v38 = vmul.f32 0.03125, %v286_v37  ;;  %v409_v39 = vmul.f32 %v407_v35, %v407_v35 }
 0x184   : > { %v288_v40 = vadd.f32 1e-05, %v287_v38  ;;  %v413_v41 = vsel %vm397_vm2, %v409_v39, 0.0 }
 0x185   : > { %414 = vadd.xlane.f32.xlu1 %v413_v41 }
 0x186   : > { %607 = vrsqrt.f32 %v288_v40 }
 0x193   : > { %v608_v42 = vpop.eup %607 }
 0x194   : > { %v290_v44 = vmul.f32 %v608_v42, %v282_v19 }
 0x196   : > { %v291_v46 = vmul.f32 %v290_v44, %v271_v43 }
 0x198   : > { %v292_v47 = vadd.f32 %v291_v46, %v272_v45 }
 0x19a   : > { %v293_v50 = vpack.c.bf16 %v292_v47, %v292_v47 }
 0x19c   : > { %v298_v51 = vsel %vm729_vm4, %v293_v50, %v297_v48 }
 0x19d   : > { %299 = vst [vmem:[%s724_s12] sm:$0x1] %v298_v51 }
 0x1a4   : > { %v471_v14 = vld [vmem:[%s724_s12] sm:$0xf] }
 0x20a   : > { %v412_v52 = vpop.xlane.xlu0 %411 }
 0x20b   : > { %v416_v53 = vmul.f32 0.03125, %v412_v52 }
 0x20d   : > { %v418_v54 = vadd.f32 1e-05, %v416_v53 }
 0x20e   : > { %v415_v55 = vpop.xlane.xlu1 %414 }
 0x20f   : > { %609 = vrsqrt.f32 %v418_v54  ;;  %v417_v57 = vmul.f32 0.03125, %v415_v55 }
 0x211   : > { %v419_v58 = vadd.f32 1e-05, %v417_v57 }
 0x213   : > { %611 = vrsqrt.f32 %v419_v58 }
 0x21c   : > { %v610_v62 = vpop.eup %609 }
 0x21d   : > { %v422_v0 = vmul.f32 %v610_v62, %v406_v31 }
 0x21f   : > { %v430_v1 = vmul.f32 %v428_v61, %v422_v0 }
 0x220   : > { %v612_v2 = vpop.eup %611 }
 0x221   : > { %v438_v3 = vadd.f32 %v436_v63, %v430_v1  ;;  %v423_v4 = vmul.f32 %v612_v2, %v407_v35 }
 0x223   : > { %v556_v5 = vpack.c.bf16 %v438_v3, %v438_v3  ;;  %v431_v6 = vmul.f32 %v428_v61, %v423_v4 }
 0x225   : > { %v449_v7 = vshrl.u32 %v556_v5, 16  ;;  %v439_v8 = vadd.f32 %v436_v63, %v431_v6  ;;  %v452_v10 = vshll.u32 %v556_v5, 16 }
 0x227   : > { %v451_v9 = vrot.slane %v449_v7, 7  ;;  %v557_v11 = vpack.c.bf16 %v439_v8, %v439_v8 }
 0x229   : > { %v454_v12 = vor.u32 %v452_v10, %v451_v9  ;;  %v457_v13 = vshrl.u32 %v557_v11, 16  ;;  %v460_v17 = vshll.u32 %v557_v11, 16  ;;  %v455_v19 = vrot.slane %v451_v9, 4 }
 0x22b   : > { %v472_v15 = vsel %vm470_vm7, %v454_v12, %v471_v14  ;;  %v459_v16 = vrot.slane %v457_v13, 7 }
 0x22c   : > { %473 = vst [vmem:[%s724_s12] sm:$0xf] %v472_v15 }
 0x22d   : > { %v462_v20 = vor.u32 %v460_v17, %v459_v16  ;;  %v464_v21 = vrot.slane %v459_v16, 4 }
 0x22f   : > { %v463_v22 = vsel %vm447_vm9, %v455_v19, %v462_v20  ;;  %v477_v23 = vsel %vm729_vm4, %v464_v21, %v476_v18 }
 0x230   : > { %475 = vst.msk [vmem:[%s724_s12 + $0x4] sm:$0xf] %vm468_vm5, %v463_v22  ;;  %478 = vst [vmem:[%s724_s12 + $0x8] sm:$0x1] %v477_v23 }
 0x231 PF: > { %s16_s21 = sadd.s32 1, %s619_s21  }
 0x232   : > { %p13_p4 = scmp.ge.s32.totalorder %s16_s21, 4  }
 0x234   :  { %15 = sbr.rel (!%p13_p4) target bundleno = 1 (0x1), region = 74 }

// kernel: tpu_custom_call.1
= control target key start
LH: loop header
LB: loop body
LE: loop exit
PB: predicated region body
PF: predicated region fallthrough
CT: control target
= control target key end

     0   :  { %s658_s21 = smov 0   ;;  %s749_s0 = inlined_call_operand.vmem [shape: bf16[2,16,128], index: 0, kind: input, shape index: {}]   ;;  %s750_s1 = inlined_call_operand.vmem [shape: bf16[128,32], index: 1, kind: input, shape index: {}]   ;;  %s751_s2 = inlined_call_operand.vmem [shape: f32[1,32], index: 2, kind: input, shape index: {}]   ;;  %s752_s3 = inlined_call_operand.vmem [shape: f32[17,32], index: 3, kind: input, shape index: {}]   ;;  %s753_s4 = inlined_call_operand.vmem [shape: f32[1,32], index: 4, kind: input, shape index: {}]   ;;  %s754_s5 = inlined_call_operand.vmem [shape: f32[1,32], index: 5, kind: input, shape index: {}]   ;;  %s755_s6 = inlined_call_operand.vmem [shape: bf16[2,17,32], index: 6, kind: output, shape index: {}]  }
   0x1 LB: > { %s534_s22 = sadd.s32 4294967295, %s619_s21   ;;  %p538_p0 = scmp.ge.s32.totalorder %s619_s21, 1  ;;  %s619_s21 = sphi %s658_s21, %s16_s21  }
   0x2   : > { %p212_p1 = scmp.lt.s32.totalorder %s619_s21, 3 }
   0x4   : > { %p213_p2 = pnand %p538_p0, %p212_p1 }
   0x5   : > { %p242_p3 = scmp.lt.s32.totalorder (!%p213_p2), %s534_s22, 1 }
   0x6   : > { %216 = sbr.rel (%p213_p2) target bundleno = 561 (0x231), region = 44 }
   0xb   : > { %v598_v0 = vld [vmem:[%s750_s1 + $0x38] sm:$0xff]   ;;  %v621_v1 = vmov 0.0   ;;  %v599_v2 = vld [vmem:[%s750_s1 + $0x30] sm:$0xff]   ;;  %vm622_vm0 = vmmov 0   ;;  %s759_s22 = smov (!%p242_p3, %s534_s22), 1  ;;  %v600_v3 = vld [vmem:[%s750_s1 + $0x28] sm:$0xff]   ;;  %v425_v56 = vlaneseq }
   0xc   : > { %567 = vmatprep.subr.bf16.mxu0 %v621_v1  ;;  %583 = vmatprep.mubr.msk.bf16.mxu0 %vm622_vm0, %v621_v1  ;;  %s555_s29 = sshll.u32 %s759_s22, 3  ;;  %v273_v4 = vld [vmem:[%s751_s2] sm:$0x1]  ;;  %vm276_vm1 = vcmask 253952   ;;  %v602_v9 = vld [vmem:[%s750_s1 + $0x18] sm:$0xff]   ;;  %v603_v10 = vld [vmem:[%s750_s1 + $0x10] sm:$0xff]  }
   0xd   : > { %568 = vmatpush3.bf16.msra.mxu0 %v598_v0  ;;  %s246_s8 = scalar_lea.vmem %s749_s0, %s555_s29  ;;  %v274_v5 = vld [vmem:[%s752_s3] sm:$0x1]  ;;  %v604_v11 = vld [vmem:[%s750_s1 + $0x8] sm:$0xff]   ;;  %vm397_vm2 = vcmask 261120   ;;  %s587_s29 = smul.u32 12, %s759_s22  ;;  %v426_v59 = vshrl.u32 %v425_v56, 7 }
   0xe   : > { %569 = vmatprep.subr.bf16.mxu0 %v621_v1  ;;  %v601_v6 = vld [vmem:[%s750_s1 + $0x20] sm:$0xff]   ;;  %v275_v7 = vadd.f32 %v274_v5, %v273_v4  ;;  %v301_v21 = vld [vmem:[%s752_s3 + $0x9] sm:$0xff]  ;;  %vm295_vm3 = vsmask.f32 256  ;;  %vm468_vm5 = vcmask 257024  }
   0xf   : > { %v605_v12 = vld [vmem:[%s750_s1] sm:$0xff]   ;;  %s724_s12 = scalar_lea.vmem %s755_s6, %s587_s29  ;;  %vm729_vm4 = vmand %vm276_vm1, %vm295_vm3  ;;  %v427_v60 = vsub.s32 0, %v426_v59  ;;  %vm469_vm6 = vsmask.f32 7938  ;;  %vm446_vm8 = vsmask.f32 4368 }
  0x10   : > { %v277_v8 = vsel %vm276_vm1, %v275_v7, 0.0  ;;  %v606_v13 = vld [vmem:[%s246_s8] sm:$0xff]   ;;  %vm470_vm7 = vmand %vm468_vm5, %vm469_vm6 }
  0x11   : > { %570 = vmatpush3.bf16.msra.mxu0 %v599_v2  ;;  %278 = vadd.xlane.f32.xlu0 %v277_v8  ;;  %v300_v16 = vld [vmem:[%s752_s3 + $0x1] sm:$0xff]  ;;  %v271_v43 = vld [vmem:[%s753_s4] sm:$0x1]  ;;  %vm447_vm9 = vmor %vm295_vm3, %vm446_vm8 }
  0x12   : > { %571 = vmatprep.subr.bf16.mxu0 %v621_v1  ;;  %v272_v45 = vld [vmem:[%s754_s5] sm:$0x1]  ;;  %v428_v61 = vrot.slane %v271_v43, %v427_v60 }
  0x13   : > { %v297_v48 = vld [vmem:[%s724_s12] sm:$0x1]  ;;  %v436_v63 = vrot.slane %v272_v45, %v427_v60 }
  0x15   : > { %572 = vmatpush3.bf16.msra.mxu0 %v600_v3 }
  0x16   : > { %573 = vmatprep.subr.bf16.mxu0 %v621_v1 }
  0x19   : > { %574 = vmatpush3.bf16.msra.mxu0 %v601_v6 }
  0x1a   : > { %575 = vmatprep.subr.bf16.mxu0 %v621_v1 }
  0x1d   : > { %576 = vmatpush3.bf16.msra.mxu0 %v602_v9 }
  0x1e   : > { %577 = vmatprep.subr.bf16.mxu0 %v621_v1 }
  0x21   : > { %578 = vmatpush3.bf16.msra.mxu0 %v603_v10 }
  0x22   : > { %579 = vmatprep.subr.bf16.mxu0 %v621_v1 }
  0x25   : > { %580 = vmatpush3.bf16.msra.mxu0 %v604_v11 }
  0x26   : > { %581 = vmatprep.subr.bf16.mxu0 %v621_v1 }
  0x29   : > { %582 = vmatpush3.bf16.msra.mxu0 %v605_v12 }
  0x2c   : > { %584 = vmatmul.mubr.bf16.vlgmr.msra.gmra.mxu0 %v606_v13 }
  0x9a   : > { %v279_v14 = vpop.xlane.xlu0 %278 }
  0x9b   : > { %v281_v15 = vmul.f32 0.03125, %v279_v14 }
  0x9d   : > { %v282_v19 = vsub.f32 %v275_v7, %v281_v15 }
  0x9f   : > { %v283_v25 = vmul.f32 %v282_v19, %v282_v19 }
  0xa1   : > { %v284_v28 = vsel %vm276_vm1, %v283_v25, 0.0 }
  0xec   : > { %v390_v17 = vpop.f32.mrf.mxu0 }
  0xed   : > { %v391_v18 = vadd.f32 %v390_v17, %v300_v16 }
  0xee   : > { %v585_v20 = vpop.f32.mrf.mxu0 }
  0xef   : > { %v398_v22 = vsel %vm397_vm2, %v391_v18, 0.0 }
  0xf0   : > { %399 = vadd.xlane.f32.xlu0 %v398_v22  ;;  %v393_v23 = vpop.f32.mrf.mxu0 }
  0xf1   : > { %v394_v24 = vadd.f32 %v393_v23, %v301_v21 }
  0xf2   : > { %v586_v26 = vpop.f32.mrf.mxu0 }
  0xf3   : > { %v401_v27 = vsel %vm397_vm2, %v394_v24, 0.0 }
  0xf4   : > { %402 = vadd.xlane.f32.xlu1 %v401_v27 }
  0xf8   : > { %285 = vadd.xlane.f32.xlu1 %v284_v28 }
 0x179   : > { %v400_v29 = vpop.xlane.xlu0 %399 }
 0x17a   : > { %v404_v30 = vmul.f32 0.03125, %v400_v29 }
 0x17c   : > { %v406_v31 = vsub.f32 %v391_v18, %v404_v30  ;;  %v476_v18 = vld [vmem:[%s724_s12 + $0x8] sm:$0x1] }
 0x17d   : > { %v403_v32 = vpop.xlane.xlu1 %402 }
 0x17e   : > { %v405_v33 = vmul.f32 0.03125, %v403_v32  ;;  %v408_v34 = vmul.f32 %v406_v31, %v406_v31 }
 0x180   : > { %v407_v35 = vsub.f32 %v394_v24, %v405_v33  ;;  %v410_v36 = vsel %vm397_vm2, %v408_v34, 0.0 }
 0x181   : > { %411 = vadd.xlane.f32.xlu0 %v410_v36  ;;  %v286_v37 = vpop.xlane.xlu1 %285 }
 0x182   : > { %v287_v38 = vmul.f32 0.03125, %v286_v37  ;;  %v409_v39 = vmul.f32 %v407_v35, %v407_v35 }
 0x184   : > { %v288_v40 = vadd.f32 1e-05, %v287_v38  ;;  %v413_v41 = vsel %vm397_vm2, %v409_v39, 0.0 }
 0x185   : > { %414 = vadd.xlane.f32.xlu1 %v413_v41 }
 0x186   : > { %607 = vrsqrt.f32 %v288_v40 }
 0x193   : > { %v608_v42 = vpop.eup %607 }
 0x194   : > { %v290_v44 = vmul.f32 %v608_v42, %v282_v19 }
 0x196   : > { %v291_v46 = vmul.f32 %v290_v44, %v271_v43 }
 0x198   : > { %v292_v47 = vadd.f32 %v291_v46, %v272_v45 }
 0x19a   : > { %v293_v50 = vpack.c.bf16 %v292_v47, %v292_v47 }
 0x19c   : > { %v298_v51 = vsel %vm729_vm4, %v293_v50, %v297_v48 }
 0x19d   : > { %299 = vst [vmem:[%s724_s12] sm:$0x1] %v298_v51 }
 0x1a4   : > { %v471_v14 = vld [vmem:[%s724_s12] sm:$0xf] }
 0x20a   : > { %v412_v52 = vpop.xlane.xlu0 %411 }
 0x20b   : > { %v416_v53 = vmul.f32 0.03125, %v412_v52 }
 0x20d   : > { %v418_v54 = vadd.f32 1e-05, %v416_v53 }
 0x20e   : > { %v415_v55 = vpop.xlane.xlu1 %414 }
 0x20f   : > { %609 = vrsqrt.f32 %v418_v54  ;;  %v417_v57 = vmul.f32 0.03125, %v415_v55 }
 0x211   : > { %v419_v58 = vadd.f32 1e-05, %v417_v57 }
 0x213   : > { %611 = vrsqrt.f32 %v419_v58 }
 0x21c   : > { %v610_v62 = vpop.eup %609 }
 0x21d   : > { %v422_v0 = vmul.f32 %v610_v62, %v406_v31 }
 0x21f   : > { %v430_v1 = vmul.f32 %v428_v61, %v422_v0 }
 0x220   : > { %v612_v2 = vpop.eup %611 }
 0x221   : > { %v438_v3 = vadd.f32 %v436_v63, %v430_v1  ;;  %v423_v4 = vmul.f32 %v612_v2, %v407_v35 }
 0x223   : > { %v556_v5 = vpack.c.bf16 %v438_v3, %v438_v3  ;;  %v431_v6 = vmul.f32 %v428_v61, %v423_v4 }
 0x225   : > { %v449_v7 = vshrl.u32 %v556_v5, 16  ;;  %v439_v8 = vadd.f32 %v436_v63, %v431_v6  ;;  %v452_v10 = vshll.u32 %v556_v5, 16 }
 0x227   : > { %v451_v9 = vrot.slane %v449_v7, 7  ;;  %v557_v11 = vpack.c.bf16 %v439_v8, %v439_v8 }
 0x229   : > { %v454_v12 = vor.u32 %v452_v10, %v451_v9  ;;  %v457_v13 = vshrl.u32 %v557_v11, 16  ;;  %v460_v17 = vshll.u32 %v557_v11, 16  ;;  %v455_v19 = vrot.slane %v451_v9, 4 }
 0x22b   : > { %v472_v15 = vsel %vm470_vm7, %v454_v12, %v471_v14  ;;  %v459_v16 = vrot.slane %v457_v13, 7 }
 0x22c   : > { %473 = vst [vmem:[%s724_s12] sm:$0xf] %v472_v15 }
 0x22d   : > { %v462_v20 = vor.u32 %v460_v17, %v459_v16  ;;  %v464_v21 = vrot.slane %v459_v16, 4 }
 0x22f   : > { %v463_v22 = vsel %vm447_vm9, %v455_v19, %v462_v20  ;;  %v477_v23 = vsel %vm729_vm4, %v464_v21, %v476_v18 }
 0x230   : > { %475 = vst.msk [vmem:[%s724_s12 + $0x4] sm:$0xf] %vm468_vm5, %v463_v22  ;;  %478 = vst [vmem:[%s724_s12 + $0x8] sm:$0x1] %v477_v23 }
 0x231 PF: > { %s16_s21 = sadd.s32 1, %s619_s21  }
 0x232   : > { %p13_p4 = scmp.ge.s32.totalorder %s16_s21, 4  }
 0x234   :  { %15 = sbr.rel (!%p13_p4) target bundleno = 1 (0x1), region = 74 }

</bundles_post_ra>
